<compile_context>
chip_gen: v7x
topology: tpu7x:2x2x1
jax: 0.10.0
libtpu: 0.0.40
codegen_flags: <defaults>
</compile_context>

<pallas_src>
import jax
import jax.numpy as jnp
from jax import lax
from jax.experimental import pallas as pl
from jax.experimental.pallas import tpu as pltpu

IN_FEATURES = 4
HIDDEN = 10
OUT_FEATURES = 3

LANES = 128
SUBLANES = 8


def _round_up(n, m):
    return ((n + m - 1) // m) * m


def mlp_kernel(xT_ref, w1_ref, b1_ref, w2_ref, b2_ref, oT_ref):
    # xT_ref: [4, S_tile, 128] VMEM   (batch on lanes, sublane rows on axis 1)
    # w1_ref: [10, 4]  SMEM    b1_ref: [10] SMEM     (PyTorch [out, in] layout)
    # w2_ref: [3, 10]  SMEM    b2_ref: [3]  SMEM
    # oT_ref: [3, S_tile, 128] VMEM
    s_tile = xT_ref.shape[1]
    sub = s_tile if s_tile < SUBLANES else SUBLANES      # register-chunk rows
    n_chunks = s_tile // sub                              # static

    # Hoist every SMEM scalar read (70 weights + 13 biases) above the batch
    # loop; each use below is a near-free scalar splat into a VPU FMA.
    w1 = [[w1_ref[j, k] for k in range(IN_FEATURES)] for j in range(HIDDEN)]
    b1 = [b1_ref[j] for j in range(HIDDEN)]
    w2 = [[w2_ref[j, k] for k in range(HIDDEN)] for j in range(OUT_FEATURES)]
    b2 = [b2_ref[j] for j in range(OUT_FEATURES)]

    def chunk(c, carry):
        off = pl.multiple_of(c * sub, sub)

        # x chunk: 4 vregs (one [sub,128] slab per input feature).
        x = [xT_ref[k, pl.ds(off, sub), :] for k in range(IN_FEATURES)]

        # Layer 1: h_j = relu(b1_j + sum_k w1[j,k] * x_k)   (40 VPU FMAs)
        h = []
        for j in range(HIDDEN):
            acc = x[0] * w1[j][0]
            for k in range(1, IN_FEATURES):
                acc = acc + x[k] * w1[j][k]
            h.append(jnp.maximum(acc + b1[j], 0.0))

        # Layer 2: out_j = b2_j + sum_k w2[j,k] * h_k        (30 VPU FMAs)
        for j in range(OUT_FEATURES):
            acc = h[0] * w2[j][0]
            for k in range(1, HIDDEN):
                acc = acc + h[k] * w2[j][k]
            oT_ref[j, pl.ds(off, sub), :] = (acc + b2[j]).astype(oT_ref.dtype)

        return carry

    lax.fori_loop(0, n_chunks, chunk, 0)


def _choose_s_tile(S):
    """Sublane rows (of 128 batch columns each) per grid step."""
    if S <= SUBLANES:
        return S                       # tiny batch: one small tile
    target = 256                       # ~32K batch columns / step
    half = _round_up((S + 1) // 2, SUBLANES)   # >= 2 grid steps (v7x megacore)
    return min(target, half)


def net_forward(x, w1, b1, w2, b2, *, block_cols=None):
    """relu(x @ w1.T + b1) @ w2.T + b2 with PyTorch-layout params.

    x: [B, 4] f32, w1: [10, 4], b1: [10], w2: [3, 10], b2: [3].
    """
    B = x.shape[0]
    assert x.shape[1] == IN_FEATURES

    S = _round_up(max(B, 1), LANES) // LANES   # sublane rows needed
    if block_cols is None:
        s_tile = _choose_s_tile(S)
    else:
        # Validate/round a user-supplied tile so it passes the (8,128) check.
        s_tile = max(1, block_cols // LANES)
        if S <= SUBLANES:
            s_tile = S
        else:
            s_tile = min(_round_up(s_tile, SUBLANES), _round_up(S, SUBLANES))

    Sp = _round_up(S, s_tile)
    Bp = Sp * LANES

    # Lane-dense packing [4, Sp, 128]; jnp.pad (no zeros+set full-array pass).
    xT = jnp.pad(x.T.astype(jnp.float32), ((0, 0), (0, Bp - B)))
    xT = xT.reshape(IN_FEATURES, Sp, LANES)

    grid = (Sp // s_tile,)
    outT = pl.pallas_call(
        mlp_kernel,
        out_shape=jax.ShapeDtypeStruct((OUT_FEATURES, Sp, LANES), jnp.float32),
        grid=grid,
        in_specs=[
            pl.BlockSpec((IN_FEATURES, s_tile, LANES), lambda i: (0, i, 0)),
            pl.BlockSpec(memory_space=pltpu.MemorySpace.SMEM),   # w1
            pl.BlockSpec(memory_space=pltpu.MemorySpace.SMEM),   # b1
            pl.BlockSpec(memory_space=pltpu.MemorySpace.SMEM),   # w2
            pl.BlockSpec(memory_space=pltpu.MemorySpace.SMEM),   # b2
        ],
        out_specs=pl.BlockSpec((OUT_FEATURES, s_tile, LANES),
                               lambda i: (0, i, 0)),
        compiler_params=pltpu.CompilerParams(
            dimension_semantics=("parallel",)),
    )(xT,
      w1.astype(jnp.float32), b1.astype(jnp.float32),
      w2.astype(jnp.float32), b2.astype(jnp.float32))

    # Back to the PyTorch-facing [B, 3] layout, dropping batch padding.
    return outT.reshape(OUT_FEATURES, Bp)[:, :B].T


def init_params(key):
    # PyTorch nn.Linear default init: U(-1/sqrt(fan_in), 1/sqrt(fan_in)),
    # weights stored in PyTorch [out_features, in_features] layout.
    k1, k2, k3, k4 = jax.random.split(key, 4)
    bound1 = 1.0 / jnp.sqrt(IN_FEATURES)
    bound2 = 1.0 / jnp.sqrt(HIDDEN)
    w1 = jax.random.uniform(k1, (HIDDEN, IN_FEATURES), jnp.float32, -bound1, bound1)
    b1 = jax.random.uniform(k2, (HIDDEN,), jnp.float32, -bound1, bound1)
    w2 = jax.random.uniform(k3, (OUT_FEATURES, HIDDEN), jnp.float32, -bound2, bound2)
    b2 = jax.random.uniform(k4, (OUT_FEATURES,), jnp.float32, -bound2, bound2)
    return w1, b1, w2, b2


if __name__ == "__main__":
    key = jax.random.PRNGKey(0)
    pkey, xkey1, xkey2 = jax.random.split(key, 3)
    w1, b1, w2, b2 = init_params(pkey)

    def ref_fn(xv):
        return jnp.maximum(xv @ w1.T + b1, 0.0) @ w2.T + b2

    # Small batch (single tile, S_tile = 1) — matches the module's tiny shapes.
    x_small = jax.random.normal(xkey1, (8, IN_FEATURES), jnp.float32)
    out_small = jax.block_until_ready(net_forward(x_small, w1, b1, w2, b2))
    assert out_small.shape == (8, OUT_FEATURES)
    assert jnp.allclose(out_small, ref_fn(x_small), atol=1e-5, rtol=1e-5)

    # Larger batch: exercises batch padding, >=2 "parallel" grid steps and the
    # in-kernel register-blocked chunk loop.
    x_big = jax.random.normal(xkey2, (5000, IN_FEATURES), jnp.float32)
    out_big = jax.block_until_ready(net_forward(x_big, w1, b1, w2, b2))
    assert out_big.shape == (5000, OUT_FEATURES)
    assert jnp.allclose(out_big, ref_fn(x_big), atol=1e-5, rtol=1e-5)

    print("KERNEL_OK")
</pallas_src>

<mosaic_0001>
module attributes {stable_mosaic.version = 11 : i64} {
  func.func @mlp_kernel(%arg0: i32, %arg1: memref<4x1x128xf32, #tpu.memory_space<vmem>>, %arg2: memref<10x4xf32, #tpu.memory_space<smem>>, %arg3: memref<10xf32, #tpu.memory_space<smem>>, %arg4: memref<3x10xf32, #tpu.memory_space<smem>>, %arg5: memref<3xf32, #tpu.memory_space<smem>>, %arg6: memref<3x1x128xf32, #tpu.memory_space<vmem>>) attributes {dimension_semantics = [#tpu.dimension_semantics<parallel>], iteration_bounds = array<i64: 1>, scalar_prefetch = 0 : i64, scratch_operands = 0 : i64, tpu.core_type = #tpu.core_type<tc>, window_params = [{transform_indices = @transform_0, window_bounds = array<i64: 4, 1, 128>}, {transform_indices = @transform_1, window_bounds = array<i64: 10, 4>}, {transform_indices = @transform_2, window_bounds = array<i64: 10>}, {transform_indices = @transform_3, window_bounds = array<i64: 3, 10>}, {transform_indices = @transform_4, window_bounds = array<i64: 3>}, {transform_indices = @transform_5, window_bounds = array<i64: 3, 1, 128>}]} {
    %c0 = arith.constant 0 : index
    %c0_0 = arith.constant 0 : index
    %0 = memref.load %arg2[%c0, %c0_0] : memref<10x4xf32, #tpu.memory_space<smem>>
    %c0_1 = arith.constant 0 : index
    %c1 = arith.constant 1 : index
    %1 = memref.load %arg2[%c0_1, %c1] : memref<10x4xf32, #tpu.memory_space<smem>>
    %c0_2 = arith.constant 0 : index
    %c2 = arith.constant 2 : index
    %2 = memref.load %arg2[%c0_2, %c2] : memref<10x4xf32, #tpu.memory_space<smem>>
    %c0_3 = arith.constant 0 : index
    %c3 = arith.constant 3 : index
    %3 = memref.load %arg2[%c0_3, %c3] : memref<10x4xf32, #tpu.memory_space<smem>>
    %c1_4 = arith.constant 1 : index
    %c0_5 = arith.constant 0 : index
    %4 = memref.load %arg2[%c1_4, %c0_5] : memref<10x4xf32, #tpu.memory_space<smem>>
    %c1_6 = arith.constant 1 : index
    %c1_7 = arith.constant 1 : index
    %5 = memref.load %arg2[%c1_6, %c1_7] : memref<10x4xf32, #tpu.memory_space<smem>>
    %c1_8 = arith.constant 1 : index
    %c2_9 = arith.constant 2 : index
    %6 = memref.load %arg2[%c1_8, %c2_9] : memref<10x4xf32, #tpu.memory_space<smem>>
    %c1_10 = arith.constant 1 : index
    %c3_11 = arith.constant 3 : index
    %7 = memref.load %arg2[%c1_10, %c3_11] : memref<10x4xf32, #tpu.memory_space<smem>>
    %c2_12 = arith.constant 2 : index
    %c0_13 = arith.constant 0 : index
    %8 = memref.load %arg2[%c2_12, %c0_13] : memref<10x4xf32, #tpu.memory_space<smem>>
    %c2_14 = arith.constant 2 : index
    %c1_15 = arith.constant 1 : index
    %9 = memref.load %arg2[%c2_14, %c1_15] : memref<10x4xf32, #tpu.memory_space<smem>>
    %c2_16 = arith.constant 2 : index
    %c2_17 = arith.constant 2 : index
    %10 = memref.load %arg2[%c2_16, %c2_17] : memref<10x4xf32, #tpu.memory_space<smem>>
    %c2_18 = arith.constant 2 : index
    %c3_19 = arith.constant 3 : index
    %11 = memref.load %arg2[%c2_18, %c3_19] : memref<10x4xf32, #tpu.memory_space<smem>>
    %c3_20 = arith.constant 3 : index
    %c0_21 = arith.constant 0 : index
    %12 = memref.load %arg2[%c3_20, %c0_21] : memref<10x4xf32, #tpu.memory_space<smem>>
    %c3_22 = arith.constant 3 : index
    %c1_23 = arith.constant 1 : index
    %13 = memref.load %arg2[%c3_22, %c1_23] : memref<10x4xf32, #tpu.memory_space<smem>>
    %c3_24 = arith.constant 3 : index
    %c2_25 = arith.constant 2 : index
    %14 = memref.load %arg2[%c3_24, %c2_25] : memref<10x4xf32, #tpu.memory_space<smem>>
    %c3_26 = arith.constant 3 : index
    %c3_27 = arith.constant 3 : index
    %15 = memref.load %arg2[%c3_26, %c3_27] : memref<10x4xf32, #tpu.memory_space<smem>>
    %c4 = arith.constant 4 : index
    %c0_28 = arith.constant 0 : index
    %16 = memref.load %arg2[%c4, %c0_28] : memref<10x4xf32, #tpu.memory_space<smem>>
    %c4_29 = arith.constant 4 : index
    %c1_30 = arith.constant 1 : index
    %17 = memref.load %arg2[%c4_29, %c1_30] : memref<10x4xf32, #tpu.memory_space<smem>>
    %c4_31 = arith.constant 4 : index
    %c2_32 = arith.constant 2 : index
    %18 = memref.load %arg2[%c4_31, %c2_32] : memref<10x4xf32, #tpu.memory_space<smem>>
    %c4_33 = arith.constant 4 : index
    %c3_34 = arith.constant 3 : index
    %19 = memref.load %arg2[%c4_33, %c3_34] : memref<10x4xf32, #tpu.memory_space<smem>>
    %c5 = arith.constant 5 : index
    %c0_35 = arith.constant 0 : index
    %20 = memref.load %arg2[%c5, %c0_35] : memref<10x4xf32, #tpu.memory_space<smem>>
    %c5_36 = arith.constant 5 : index
    %c1_37 = arith.constant 1 : index
    %21 = memref.load %arg2[%c5_36, %c1_37] : memref<10x4xf32, #tpu.memory_space<smem>>
    %c5_38 = arith.constant 5 : index
    %c2_39 = arith.constant 2 : index
    %22 = memref.load %arg2[%c5_38, %c2_39] : memref<10x4xf32, #tpu.memory_space<smem>>
    %c5_40 = arith.constant 5 : index
    %c3_41 = arith.constant 3 : index
    %23 = memref.load %arg2[%c5_40, %c3_41] : memref<10x4xf32, #tpu.memory_space<smem>>
    %c6 = arith.constant 6 : index
    %c0_42 = arith.constant 0 : index
    %24 = memref.load %arg2[%c6, %c0_42] : memref<10x4xf32, #tpu.memory_space<smem>>
    %c6_43 = arith.constant 6 : index
    %c1_44 = arith.constant 1 : index
    %25 = memref.load %arg2[%c6_43, %c1_44] : memref<10x4xf32, #tpu.memory_space<smem>>
    %c6_45 = arith.constant 6 : index
    %c2_46 = arith.constant 2 : index
    %26 = memref.load %arg2[%c6_45, %c2_46] : memref<10x4xf32, #tpu.memory_space<smem>>
    %c6_47 = arith.constant 6 : index
    %c3_48 = arith.constant 3 : index
    %27 = memref.load %arg2[%c6_47, %c3_48] : memref<10x4xf32, #tpu.memory_space<smem>>
    %c7 = arith.constant 7 : index
    %c0_49 = arith.constant 0 : index
    %28 = memref.load %arg2[%c7, %c0_49] : memref<10x4xf32, #tpu.memory_space<smem>>
    %c7_50 = arith.constant 7 : index
    %c1_51 = arith.constant 1 : index
    %29 = memref.load %arg2[%c7_50, %c1_51] : memref<10x4xf32, #tpu.memory_space<smem>>
    %c7_52 = arith.constant 7 : index
    %c2_53 = arith.constant 2 : index
    %30 = memref.load %arg2[%c7_52, %c2_53] : memref<10x4xf32, #tpu.memory_space<smem>>
    %c7_54 = arith.constant 7 : index
    %c3_55 = arith.constant 3 : index
    %31 = memref.load %arg2[%c7_54, %c3_55] : memref<10x4xf32, #tpu.memory_space<smem>>
    %c8 = arith.constant 8 : index
    %c0_56 = arith.constant 0 : index
    %32 = memref.load %arg2[%c8, %c0_56] : memref<10x4xf32, #tpu.memory_space<smem>>
    %c8_57 = arith.constant 8 : index
    %c1_58 = arith.constant 1 : index
    %33 = memref.load %arg2[%c8_57, %c1_58] : memref<10x4xf32, #tpu.memory_space<smem>>
    %c8_59 = arith.constant 8 : index
    %c2_60 = arith.constant 2 : index
    %34 = memref.load %arg2[%c8_59, %c2_60] : memref<10x4xf32, #tpu.memory_space<smem>>
    %c8_61 = arith.constant 8 : index
    %c3_62 = arith.constant 3 : index
    %35 = memref.load %arg2[%c8_61, %c3_62] : memref<10x4xf32, #tpu.memory_space<smem>>
    %c9 = arith.constant 9 : index
    %c0_63 = arith.constant 0 : index
    %36 = memref.load %arg2[%c9, %c0_63] : memref<10x4xf32, #tpu.memory_space<smem>>
    %c9_64 = arith.constant 9 : index
    %c1_65 = arith.constant 1 : index
    %37 = memref.load %arg2[%c9_64, %c1_65] : memref<10x4xf32, #tpu.memory_space<smem>>
    %c9_66 = arith.constant 9 : index
    %c2_67 = arith.constant 2 : index
    %38 = memref.load %arg2[%c9_66, %c2_67] : memref<10x4xf32, #tpu.memory_space<smem>>
    %c9_68 = arith.constant 9 : index
    %c3_69 = arith.constant 3 : index
    %39 = memref.load %arg2[%c9_68, %c3_69] : memref<10x4xf32, #tpu.memory_space<smem>>
    %c0_70 = arith.constant 0 : index
    %40 = memref.load %arg3[%c0_70] : memref<10xf32, #tpu.memory_space<smem>>
    %c1_71 = arith.constant 1 : index
    %41 = memref.load %arg3[%c1_71] : memref<10xf32, #tpu.memory_space<smem>>
    %c2_72 = arith.constant 2 : index
    %42 = memref.load %arg3[%c2_72] : memref<10xf32, #tpu.memory_space<smem>>
    %c3_73 = arith.constant 3 : index
    %43 = memref.load %arg3[%c3_73] : memref<10xf32, #tpu.memory_space<smem>>
    %c4_74 = arith.constant 4 : index
    %44 = memref.load %arg3[%c4_74] : memref<10xf32, #tpu.memory_space<smem>>
    %c5_75 = arith.constant 5 : index
    %45 = memref.load %arg3[%c5_75] : memref<10xf32, #tpu.memory_space<smem>>
    %c6_76 = arith.constant 6 : index
    %46 = memref.load %arg3[%c6_76] : memref<10xf32, #tpu.memory_space<smem>>
    %c7_77 = arith.constant 7 : index
    %47 = memref.load %arg3[%c7_77] : memref<10xf32, #tpu.memory_space<smem>>
    %c8_78 = arith.constant 8 : index
    %48 = memref.load %arg3[%c8_78] : memref<10xf32, #tpu.memory_space<smem>>
    %c9_79 = arith.constant 9 : index
    %49 = memref.load %arg3[%c9_79] : memref<10xf32, #tpu.memory_space<smem>>
    %c0_80 = arith.constant 0 : index
    %c0_81 = arith.constant 0 : index
    %50 = memref.load %arg4[%c0_80, %c0_81] : memref<3x10xf32, #tpu.memory_space<smem>>
    %c0_82 = arith.constant 0 : index
    %c1_83 = arith.constant 1 : index
    %51 = memref.load %arg4[%c0_82, %c1_83] : memref<3x10xf32, #tpu.memory_space<smem>>
    %c0_84 = arith.constant 0 : index
    %c2_85 = arith.constant 2 : index
    %52 = memref.load %arg4[%c0_84, %c2_85] : memref<3x10xf32, #tpu.memory_space<smem>>
    %c0_86 = arith.constant 0 : index
    %c3_87 = arith.constant 3 : index
    %53 = memref.load %arg4[%c0_86, %c3_87] : memref<3x10xf32, #tpu.memory_space<smem>>
    %c0_88 = arith.constant 0 : index
    %c4_89 = arith.constant 4 : index
    %54 = memref.load %arg4[%c0_88, %c4_89] : memref<3x10xf32, #tpu.memory_space<smem>>
    %c0_90 = arith.constant 0 : index
    %c5_91 = arith.constant 5 : index
    %55 = memref.load %arg4[%c0_90, %c5_91] : memref<3x10xf32, #tpu.memory_space<smem>>
    %c0_92 = arith.constant 0 : index
    %c6_93 = arith.constant 6 : index
    %56 = memref.load %arg4[%c0_92, %c6_93] : memref<3x10xf32, #tpu.memory_space<smem>>
    %c0_94 = arith.constant 0 : index
    %c7_95 = arith.constant 7 : index
    %57 = memref.load %arg4[%c0_94, %c7_95] : memref<3x10xf32, #tpu.memory_space<smem>>
    %c0_96 = arith.constant 0 : index
    %c8_97 = arith.constant 8 : index
    %58 = memref.load %arg4[%c0_96, %c8_97] : memref<3x10xf32, #tpu.memory_space<smem>>
    %c0_98 = arith.constant 0 : index
    %c9_99 = arith.constant 9 : index
    %59 = memref.load %arg4[%c0_98, %c9_99] : memref<3x10xf32, #tpu.memory_space<smem>>
    %c1_100 = arith.constant 1 : index
    %c0_101 = arith.constant 0 : index
    %60 = memref.load %arg4[%c1_100, %c0_101] : memref<3x10xf32, #tpu.memory_space<smem>>
    %c1_102 = arith.constant 1 : index
    %c1_103 = arith.constant 1 : index
    %61 = memref.load %arg4[%c1_102, %c1_103] : memref<3x10xf32, #tpu.memory_space<smem>>
    %c1_104 = arith.constant 1 : index
    %c2_105 = arith.constant 2 : index
    %62 = memref.load %arg4[%c1_104, %c2_105] : memref<3x10xf32, #tpu.memory_space<smem>>
    %c1_106 = arith.constant 1 : index
    %c3_107 = arith.constant 3 : index
    %63 = memref.load %arg4[%c1_106, %c3_107] : memref<3x10xf32, #tpu.memory_space<smem>>
    %c1_108 = arith.constant 1 : index
    %c4_109 = arith.constant 4 : index
    %64 = memref.load %arg4[%c1_108, %c4_109] : memref<3x10xf32, #tpu.memory_space<smem>>
    %c1_110 = arith.constant 1 : index
    %c5_111 = arith.constant 5 : index
    %65 = memref.load %arg4[%c1_110, %c5_111] : memref<3x10xf32, #tpu.memory_space<smem>>
    %c1_112 = arith.constant 1 : index
    %c6_113 = arith.constant 6 : index
    %66 = memref.load %arg4[%c1_112, %c6_113] : memref<3x10xf32, #tpu.memory_space<smem>>
    %c1_114 = arith.constant 1 : index
    %c7_115 = arith.constant 7 : index
    %67 = memref.load %arg4[%c1_114, %c7_115] : memref<3x10xf32, #tpu.memory_space<smem>>
    %c1_116 = arith.constant 1 : index
    %c8_117 = arith.constant 8 : index
    %68 = memref.load %arg4[%c1_116, %c8_117] : memref<3x10xf32, #tpu.memory_space<smem>>
    %c1_118 = arith.constant 1 : index
    %c9_119 = arith.constant 9 : index
    %69 = memref.load %arg4[%c1_118, %c9_119] : memref<3x10xf32, #tpu.memory_space<smem>>
    %c2_120 = arith.constant 2 : index
    %c0_121 = arith.constant 0 : index
    %70 = memref.load %arg4[%c2_120, %c0_121] : memref<3x10xf32, #tpu.memory_space<smem>>
    %c2_122 = arith.constant 2 : index
    %c1_123 = arith.constant 1 : index
    %71 = memref.load %arg4[%c2_122, %c1_123] : memref<3x10xf32, #tpu.memory_space<smem>>
    %c2_124 = arith.constant 2 : index
    %c2_125 = arith.constant 2 : index
    %72 = memref.load %arg4[%c2_124, %c2_125] : memref<3x10xf32, #tpu.memory_space<smem>>
    %c2_126 = arith.constant 2 : index
    %c3_127 = arith.constant 3 : index
    %73 = memref.load %arg4[%c2_126, %c3_127] : memref<3x10xf32, #tpu.memory_space<smem>>
    %c2_128 = arith.constant 2 : index
    %c4_129 = arith.constant 4 : index
    %74 = memref.load %arg4[%c2_128, %c4_129] : memref<3x10xf32, #tpu.memory_space<smem>>
    %c2_130 = arith.constant 2 : index
    %c5_131 = arith.constant 5 : index
    %75 = memref.load %arg4[%c2_130, %c5_131] : memref<3x10xf32, #tpu.memory_space<smem>>
    %c2_132 = arith.constant 2 : index
    %c6_133 = arith.constant 6 : index
    %76 = memref.load %arg4[%c2_132, %c6_133] : memref<3x10xf32, #tpu.memory_space<smem>>
    %c2_134 = arith.constant 2 : index
    %c7_135 = arith.constant 7 : index
    %77 = memref.load %arg4[%c2_134, %c7_135] : memref<3x10xf32, #tpu.memory_space<smem>>
    %c2_136 = arith.constant 2 : index
    %c8_137 = arith.constant 8 : index
    %78 = memref.load %arg4[%c2_136, %c8_137] : memref<3x10xf32, #tpu.memory_space<smem>>
    %c2_138 = arith.constant 2 : index
    %c9_139 = arith.constant 9 : index
    %79 = memref.load %arg4[%c2_138, %c9_139] : memref<3x10xf32, #tpu.memory_space<smem>>
    %c0_140 = arith.constant 0 : index
    %80 = memref.load %arg5[%c0_140] : memref<3xf32, #tpu.memory_space<smem>>
    %c1_141 = arith.constant 1 : index
    %81 = memref.load %arg5[%c1_141] : memref<3xf32, #tpu.memory_space<smem>>
    %c2_142 = arith.constant 2 : index
    %82 = memref.load %arg5[%c2_142] : memref<3xf32, #tpu.memory_space<smem>>
    %c0_i32 = arith.constant 0 : i32
    %c1_i32 = arith.constant 1 : i32
    %83 = arith.muli %c0_i32, %c1_i32 : i32
    %84 = tpu.assume_multiple %83, 1 : i32
    %c0_143 = arith.constant 0 : index
    %85 = arith.index_cast %84 : i32 to index
    %c0_144 = arith.constant 0 : index
    %86 = vector.load %arg1[%c0_143, %85, %c0_144] : memref<4x1x128xf32, #tpu.memory_space<vmem>>, vector<1x1x128xf32>
    %87 = vector.shape_cast %86 : vector<1x1x128xf32> to vector<1x128xf32>
    %c1_145 = arith.constant 1 : index
    %88 = arith.index_cast %84 : i32 to index
    %c0_146 = arith.constant 0 : index
    %89 = vector.load %arg1[%c1_145, %88, %c0_146] : memref<4x1x128xf32, #tpu.memory_space<vmem>>, vector<1x1x128xf32>
    %90 = vector.shape_cast %89 : vector<1x1x128xf32> to vector<1x128xf32>
    %c2_147 = arith.constant 2 : index
    %91 = arith.index_cast %84 : i32 to index
    %c0_148 = arith.constant 0 : index
    %92 = vector.load %arg1[%c2_147, %91, %c0_148] : memref<4x1x128xf32, #tpu.memory_space<vmem>>, vector<1x1x128xf32>
    %93 = vector.shape_cast %92 : vector<1x1x128xf32> to vector<1x128xf32>
    %c3_149 = arith.constant 3 : index
    %94 = arith.index_cast %84 : i32 to index
    %c0_150 = arith.constant 0 : index
    %95 = vector.load %arg1[%c3_149, %94, %c0_150] : memref<4x1x128xf32, #tpu.memory_space<vmem>>, vector<1x1x128xf32>
    %96 = vector.shape_cast %95 : vector<1x1x128xf32> to vector<1x128xf32>
    %97 = vector.broadcast %0 : f32 to vector<1x128xf32>
    %98 = arith.mulf %87, %97 : vector<1x128xf32>
    %99 = vector.broadcast %1 : f32 to vector<1x128xf32>
    %100 = arith.mulf %90, %99 : vector<1x128xf32>
    %101 = arith.addf %98, %100 : vector<1x128xf32>
    %102 = vector.broadcast %2 : f32 to vector<1x128xf32>
    %103 = arith.mulf %93, %102 : vector<1x128xf32>
    %104 = arith.addf %101, %103 : vector<1x128xf32>
    %105 = vector.broadcast %3 : f32 to vector<1x128xf32>
    %106 = arith.mulf %96, %105 : vector<1x128xf32>
    %107 = arith.addf %104, %106 : vector<1x128xf32>
    %108 = vector.broadcast %40 : f32 to vector<1x128xf32>
    %109 = arith.addf %107, %108 : vector<1x128xf32>
    %cst = arith.constant 0.000000e+00 : f32
    %110 = vector.broadcast %cst : f32 to vector<1x128xf32>
    %111 = arith.maximumf %109, %110 : vector<1x128xf32>
    %112 = vector.broadcast %4 : f32 to vector<1x128xf32>
    %113 = arith.mulf %87, %112 : vector<1x128xf32>
    %114 = vector.broadcast %5 : f32 to vector<1x128xf32>
    %115 = arith.mulf %90, %114 : vector<1x128xf32>
    %116 = arith.addf %113, %115 : vector<1x128xf32>
    %117 = vector.broadcast %6 : f32 to vector<1x128xf32>
    %118 = arith.mulf %93, %117 : vector<1x128xf32>
    %119 = arith.addf %116, %118 : vector<1x128xf32>
    %120 = vector.broadcast %7 : f32 to vector<1x128xf32>
    %121 = arith.mulf %96, %120 : vector<1x128xf32>
    %122 = arith.addf %119, %121 : vector<1x128xf32>
    %123 = vector.broadcast %41 : f32 to vector<1x128xf32>
    %124 = arith.addf %122, %123 : vector<1x128xf32>
    %cst_151 = arith.constant 0.000000e+00 : f32
    %125 = vector.broadcast %cst_151 : f32 to vector<1x128xf32>
    %126 = arith.maximumf %124, %125 : vector<1x128xf32>
    %127 = vector.broadcast %8 : f32 to vector<1x128xf32>
    %128 = arith.mulf %87, %127 : vector<1x128xf32>
    %129 = vector.broadcast %9 : f32 to vector<1x128xf32>
    %130 = arith.mulf %90, %129 : vector<1x128xf32>
    %131 = arith.addf %128, %130 : vector<1x128xf32>
    %132 = vector.broadcast %10 : f32 to vector<1x128xf32>
    %133 = arith.mulf %93, %132 : vector<1x128xf32>
    %134 = arith.addf %131, %133 : vector<1x128xf32>
    %135 = vector.broadcast %11 : f32 to vector<1x128xf32>
    %136 = arith.mulf %96, %135 : vector<1x128xf32>
    %137 = arith.addf %134, %136 : vector<1x128xf32>
    %138 = vector.broadcast %42 : f32 to vector<1x128xf32>
    %139 = arith.addf %137, %138 : vector<1x128xf32>
    %cst_152 = arith.constant 0.000000e+00 : f32
    %140 = vector.broadcast %cst_152 : f32 to vector<1x128xf32>
    %141 = arith.maximumf %139, %140 : vector<1x128xf32>
    %142 = vector.broadcast %12 : f32 to vector<1x128xf32>
    %143 = arith.mulf %87, %142 : vector<1x128xf32>
    %144 = vector.broadcast %13 : f32 to vector<1x128xf32>
    %145 = arith.mulf %90, %144 : vector<1x128xf32>
    %146 = arith.addf %143, %145 : vector<1x128xf32>
    %147 = vector.broadcast %14 : f32 to vector<1x128xf32>
    %148 = arith.mulf %93, %147 : vector<1x128xf32>
    %149 = arith.addf %146, %148 : vector<1x128xf32>
    %150 = vector.broadcast %15 : f32 to vector<1x128xf32>
    %151 = arith.mulf %96, %150 : vector<1x128xf32>
    %152 = arith.addf %149, %151 : vector<1x128xf32>
    %153 = vector.broadcast %43 : f32 to vector<1x128xf32>
    %154 = arith.addf %152, %153 : vector<1x128xf32>
    %cst_153 = arith.constant 0.000000e+00 : f32
    %155 = vector.broadcast %cst_153 : f32 to vector<1x128xf32>
    %156 = arith.maximumf %154, %155 : vector<1x128xf32>
    %157 = vector.broadcast %16 : f32 to vector<1x128xf32>
    %158 = arith.mulf %87, %157 : vector<1x128xf32>
    %159 = vector.broadcast %17 : f32 to vector<1x128xf32>
    %160 = arith.mulf %90, %159 : vector<1x128xf32>
    %161 = arith.addf %158, %160 : vector<1x128xf32>
    %162 = vector.broadcast %18 : f32 to vector<1x128xf32>
    %163 = arith.mulf %93, %162 : vector<1x128xf32>
    %164 = arith.addf %161, %163 : vector<1x128xf32>
    %165 = vector.broadcast %19 : f32 to vector<1x128xf32>
    %166 = arith.mulf %96, %165 : vector<1x128xf32>
    %167 = arith.addf %164, %166 : vector<1x128xf32>
    %168 = vector.broadcast %44 : f32 to vector<1x128xf32>
    %169 = arith.addf %167, %168 : vector<1x128xf32>
    %cst_154 = arith.constant 0.000000e+00 : f32
    %170 = vector.broadcast %cst_154 : f32 to vector<1x128xf32>
    %171 = arith.maximumf %169, %170 : vector<1x128xf32>
    %172 = vector.broadcast %20 : f32 to vector<1x128xf32>
    %173 = arith.mulf %87, %172 : vector<1x128xf32>
    %174 = vector.broadcast %21 : f32 to vector<1x128xf32>
    %175 = arith.mulf %90, %174 : vector<1x128xf32>
    %176 = arith.addf %173, %175 : vector<1x128xf32>
    %177 = vector.broadcast %22 : f32 to vector<1x128xf32>
    %178 = arith.mulf %93, %177 : vector<1x128xf32>
    %179 = arith.addf %176, %178 : vector<1x128xf32>
    %180 = vector.broadcast %23 : f32 to vector<1x128xf32>
    %181 = arith.mulf %96, %180 : vector<1x128xf32>
    %182 = arith.addf %179, %181 : vector<1x128xf32>
    %183 = vector.broadcast %45 : f32 to vector<1x128xf32>
    %184 = arith.addf %182, %183 : vector<1x128xf32>
    %cst_155 = arith.constant 0.000000e+00 : f32
    %185 = vector.broadcast %cst_155 : f32 to vector<1x128xf32>
    %186 = arith.maximumf %184, %185 : vector<1x128xf32>
    %187 = vector.broadcast %24 : f32 to vector<1x128xf32>
    %188 = arith.mulf %87, %187 : vector<1x128xf32>
    %189 = vector.broadcast %25 : f32 to vector<1x128xf32>
    %190 = arith.mulf %90, %189 : vector<1x128xf32>
    %191 = arith.addf %188, %190 : vector<1x128xf32>
    %192 = vector.broadcast %26 : f32 to vector<1x128xf32>
    %193 = arith.mulf %93, %192 : vector<1x128xf32>
    %194 = arith.addf %191, %193 : vector<1x128xf32>
    %195 = vector.broadcast %27 : f32 to vector<1x128xf32>
    %196 = arith.mulf %96, %195 : vector<1x128xf32>
    %197 = arith.addf %194, %196 : vector<1x128xf32>
    %198 = vector.broadcast %46 : f32 to vector<1x128xf32>
    %199 = arith.addf %197, %198 : vector<1x128xf32>
    %cst_156 = arith.constant 0.000000e+00 : f32
    %200 = vector.broadcast %cst_156 : f32 to vector<1x128xf32>
    %201 = arith.maximumf %199, %200 : vector<1x128xf32>
    %202 = vector.broadcast %28 : f32 to vector<1x128xf32>
    %203 = arith.mulf %87, %202 : vector<1x128xf32>
    %204 = vector.broadcast %29 : f32 to vector<1x128xf32>
    %205 = arith.mulf %90, %204 : vector<1x128xf32>
    %206 = arith.addf %203, %205 : vector<1x128xf32>
    %207 = vector.broadcast %30 : f32 to vector<1x128xf32>
    %208 = arith.mulf %93, %207 : vector<1x128xf32>
    %209 = arith.addf %206, %208 : vector<1x128xf32>
    %210 = vector.broadcast %31 : f32 to vector<1x128xf32>
    %211 = arith.mulf %96, %210 : vector<1x128xf32>
    %212 = arith.addf %209, %211 : vector<1x128xf32>
    %213 = vector.broadcast %47 : f32 to vector<1x128xf32>
    %214 = arith.addf %212, %213 : vector<1x128xf32>
    %cst_157 = arith.constant 0.000000e+00 : f32
    %215 = vector.broadcast %cst_157 : f32 to vector<1x128xf32>
    %216 = arith.maximumf %214, %215 : vector<1x128xf32>
    %217 = vector.broadcast %32 : f32 to vector<1x128xf32>
    %218 = arith.mulf %87, %217 : vector<1x128xf32>
    %219 = vector.broadcast %33 : f32 to vector<1x128xf32>
    %220 = arith.mulf %90, %219 : vector<1x128xf32>
    %221 = arith.addf %218, %220 : vector<1x128xf32>
    %222 = vector.broadcast %34 : f32 to vector<1x128xf32>
    %223 = arith.mulf %93, %222 : vector<1x128xf32>
    %224 = arith.addf %221, %223 : vector<1x128xf32>
    %225 = vector.broadcast %35 : f32 to vector<1x128xf32>
    %226 = arith.mulf %96, %225 : vector<1x128xf32>
    %227 = arith.addf %224, %226 : vector<1x128xf32>
    %228 = vector.broadcast %48 : f32 to vector<1x128xf32>
    %229 = arith.addf %227, %228 : vector<1x128xf32>
    %cst_158 = arith.constant 0.000000e+00 : f32
    %230 = vector.broadcast %cst_158 : f32 to vector<1x128xf32>
    %231 = arith.maximumf %229, %230 : vector<1x128xf32>
    %232 = vector.broadcast %36 : f32 to vector<1x128xf32>
    %233 = arith.mulf %87, %232 : vector<1x128xf32>
    %234 = vector.broadcast %37 : f32 to vector<1x128xf32>
    %235 = arith.mulf %90, %234 : vector<1x128xf32>
    %236 = arith.addf %233, %235 : vector<1x128xf32>
    %237 = vector.broadcast %38 : f32 to vector<1x128xf32>
    %238 = arith.mulf %93, %237 : vector<1x128xf32>
    %239 = arith.addf %236, %238 : vector<1x128xf32>
    %240 = vector.broadcast %39 : f32 to vector<1x128xf32>
    %241 = arith.mulf %96, %240 : vector<1x128xf32>
    %242 = arith.addf %239, %241 : vector<1x128xf32>
    %243 = vector.broadcast %49 : f32 to vector<1x128xf32>
    %244 = arith.addf %242, %243 : vector<1x128xf32>
    %cst_159 = arith.constant 0.000000e+00 : f32
    %245 = vector.broadcast %cst_159 : f32 to vector<1x128xf32>
    %246 = arith.maximumf %244, %245 : vector<1x128xf32>
    %247 = vector.broadcast %50 : f32 to vector<1x128xf32>
    %248 = arith.mulf %111, %247 : vector<1x128xf32>
    %249 = vector.broadcast %51 : f32 to vector<1x128xf32>
    %250 = arith.mulf %126, %249 : vector<1x128xf32>
    %251 = arith.addf %248, %250 : vector<1x128xf32>
    %252 = vector.broadcast %52 : f32 to vector<1x128xf32>
    %253 = arith.mulf %141, %252 : vector<1x128xf32>
    %254 = arith.addf %251, %253 : vector<1x128xf32>
    %255 = vector.broadcast %53 : f32 to vector<1x128xf32>
    %256 = arith.mulf %156, %255 : vector<1x128xf32>
    %257 = arith.addf %254, %256 : vector<1x128xf32>
    %258 = vector.broadcast %54 : f32 to vector<1x128xf32>
    %259 = arith.mulf %171, %258 : vector<1x128xf32>
    %260 = arith.addf %257, %259 : vector<1x128xf32>
    %261 = vector.broadcast %55 : f32 to vector<1x128xf32>
    %262 = arith.mulf %186, %261 : vector<1x128xf32>
    %263 = arith.addf %260, %262 : vector<1x128xf32>
    %264 = vector.broadcast %56 : f32 to vector<1x128xf32>
    %265 = arith.mulf %201, %264 : vector<1x128xf32>
    %266 = arith.addf %263, %265 : vector<1x128xf32>
    %267 = vector.broadcast %57 : f32 to vector<1x128xf32>
    %268 = arith.mulf %216, %267 : vector<1x128xf32>
    %269 = arith.addf %266, %268 : vector<1x128xf32>
    %270 = vector.broadcast %58 : f32 to vector<1x128xf32>
    %271 = arith.mulf %231, %270 : vector<1x128xf32>
    %272 = arith.addf %269, %271 : vector<1x128xf32>
    %273 = vector.broadcast %59 : f32 to vector<1x128xf32>
    %274 = arith.mulf %246, %273 : vector<1x128xf32>
    %275 = arith.addf %272, %274 : vector<1x128xf32>
    %276 = vector.broadcast %80 : f32 to vector<1x128xf32>
    %277 = arith.addf %275, %276 : vector<1x128xf32>
    %c0_160 = arith.constant 0 : index
    %278 = arith.index_cast %84 : i32 to index
    %c0_161 = arith.constant 0 : index
    %279 = vector.load %arg6[%c0_160, %278, %c0_161] : memref<3x1x128xf32, #tpu.memory_space<vmem>>, vector<1x1x128xf32>
    %280 = vector.shape_cast %279 : vector<1x1x128xf32> to vector<1x128xf32>
    %281 = vector.shape_cast %277 : vector<1x128xf32> to vector<1x1x128xf32>
    tpu.vector_store %arg6[%c0_160, %278, %c0_161], %281 {strides = array<i32>} : memref<3x1x128xf32, #tpu.memory_space<vmem>>, vector<1x1x128xf32>,
    %282 = vector.broadcast %60 : f32 to vector<1x128xf32>
    %283 = arith.mulf %111, %282 : vector<1x128xf32>
    %284 = vector.broadcast %61 : f32 to vector<1x128xf32>
    %285 = arith.mulf %126, %284 : vector<1x128xf32>
    %286 = arith.addf %283, %285 : vector<1x128xf32>
    %287 = vector.broadcast %62 : f32 to vector<1x128xf32>
    %288 = arith.mulf %141, %287 : vector<1x128xf32>
    %289 = arith.addf %286, %288 : vector<1x128xf32>
    %290 = vector.broadcast %63 : f32 to vector<1x128xf32>
    %291 = arith.mulf %156, %290 : vector<1x128xf32>
    %292 = arith.addf %289, %291 : vector<1x128xf32>
    %293 = vector.broadcast %64 : f32 to vector<1x128xf32>
    %294 = arith.mulf %171, %293 : vector<1x128xf32>
    %295 = arith.addf %292, %294 : vector<1x128xf32>
    %296 = vector.broadcast %65 : f32 to vector<1x128xf32>
    %297 = arith.mulf %186, %296 : vector<1x128xf32>
    %298 = arith.addf %295, %297 : vector<1x128xf32>
    %299 = vector.broadcast %66 : f32 to vector<1x128xf32>
    %300 = arith.mulf %201, %299 : vector<1x128xf32>
    %301 = arith.addf %298, %300 : vector<1x128xf32>
    %302 = vector.broadcast %67 : f32 to vector<1x128xf32>
    %303 = arith.mulf %216, %302 : vector<1x128xf32>
    %304 = arith.addf %301, %303 : vector<1x128xf32>
    %305 = vector.broadcast %68 : f32 to vector<1x128xf32>
    %306 = arith.mulf %231, %305 : vector<1x128xf32>
    %307 = arith.addf %304, %306 : vector<1x128xf32>
    %308 = vector.broadcast %69 : f32 to vector<1x128xf32>
    %309 = arith.mulf %246, %308 : vector<1x128xf32>
    %310 = arith.addf %307, %309 : vector<1x128xf32>
    %311 = vector.broadcast %81 : f32 to vector<1x128xf32>
    %312 = arith.addf %310, %311 : vector<1x128xf32>
    %c1_162 = arith.constant 1 : index
    %313 = arith.index_cast %84 : i32 to index
    %c0_163 = arith.constant 0 : index
    %314 = vector.load %arg6[%c1_162, %313, %c0_163] : memref<3x1x128xf32, #tpu.memory_space<vmem>>, vector<1x1x128xf32>
    %315 = vector.shape_cast %314 : vector<1x1x128xf32> to vector<1x128xf32>
    %316 = vector.shape_cast %312 : vector<1x128xf32> to vector<1x1x128xf32>
    tpu.vector_store %arg6[%c1_162, %313, %c0_163], %316 {strides = array<i32>} : memref<3x1x128xf32, #tpu.memory_space<vmem>>, vector<1x1x128xf32>,
    %317 = vector.broadcast %70 : f32 to vector<1x128xf32>
    %318 = arith.mulf %111, %317 : vector<1x128xf32>
    %319 = vector.broadcast %71 : f32 to vector<1x128xf32>
    %320 = arith.mulf %126, %319 : vector<1x128xf32>
    %321 = arith.addf %318, %320 : vector<1x128xf32>
    %322 = vector.broadcast %72 : f32 to vector<1x128xf32>
    %323 = arith.mulf %141, %322 : vector<1x128xf32>
    %324 = arith.addf %321, %323 : vector<1x128xf32>
    %325 = vector.broadcast %73 : f32 to vector<1x128xf32>
    %326 = arith.mulf %156, %325 : vector<1x128xf32>
    %327 = arith.addf %324, %326 : vector<1x128xf32>
    %328 = vector.broadcast %74 : f32 to vector<1x128xf32>
    %329 = arith.mulf %171, %328 : vector<1x128xf32>
    %330 = arith.addf %327, %329 : vector<1x128xf32>
    %331 = vector.broadcast %75 : f32 to vector<1x128xf32>
    %332 = arith.mulf %186, %331 : vector<1x128xf32>
    %333 = arith.addf %330, %332 : vector<1x128xf32>
    %334 = vector.broadcast %76 : f32 to vector<1x128xf32>
    %335 = arith.mulf %201, %334 : vector<1x128xf32>
    %336 = arith.addf %333, %335 : vector<1x128xf32>
    %337 = vector.broadcast %77 : f32 to vector<1x128xf32>
    %338 = arith.mulf %216, %337 : vector<1x128xf32>
    %339 = arith.addf %336, %338 : vector<1x128xf32>
    %340 = vector.broadcast %78 : f32 to vector<1x128xf32>
    %341 = arith.mulf %231, %340 : vector<1x128xf32>
    %342 = arith.addf %339, %341 : vector<1x128xf32>
    %343 = vector.broadcast %79 : f32 to vector<1x128xf32>
    %344 = arith.mulf %246, %343 : vector<1x128xf32>
    %345 = arith.addf %342, %344 : vector<1x128xf32>
    %346 = vector.broadcast %82 : f32 to vector<1x128xf32>
    %347 = arith.addf %345, %346 : vector<1x128xf32>
    %c2_164 = arith.constant 2 : index
    %348 = arith.index_cast %84 : i32 to index
    %c0_165 = arith.constant 0 : index
    %349 = vector.load %arg6[%c2_164, %348, %c0_165] : memref<3x1x128xf32, #tpu.memory_space<vmem>>, vector<1x1x128xf32>
    %350 = vector.shape_cast %349 : vector<1x1x128xf32> to vector<1x128xf32>
    %351 = vector.shape_cast %347 : vector<1x128xf32> to vector<1x1x128xf32>
    tpu.vector_store %arg6[%c2_164, %348, %c0_165], %351 {strides = array<i32>} : memref<3x1x128xf32, #tpu.memory_space<vmem>>, vector<1x1x128xf32>,
    %c1_i32_166 = arith.constant 1 : i32
    return
  }
  func.func @transform_0(%arg0: i32) -> (i32, i32, i32) {
    %c0_i32 = arith.constant 0 : i32
    %c0_i32_0 = arith.constant 0 : i32
    %c0_i32_1 = arith.constant 0 : i32
    return %c0_i32, %arg0, %c0_i32_0 : i32, i32, i32
  }
  func.func @transform_1(%arg0: i32) -> (i32, i32) {
    %c0_i32 = arith.constant 0 : i32
    %c0_i32_0 = arith.constant 0 : i32
    %c0_i32_1 = arith.constant 0 : i32
    return %c0_i32, %c0_i32_0 : i32, i32
  }
  func.func @transform_2(%arg0: i32) -> i32 {
    %c0_i32 = arith.constant 0 : i32
    %c0_i32_0 = arith.constant 0 : i32
    return %c0_i32 : i32
  }
  func.func @transform_3(%arg0: i32) -> (i32, i32) {
    %c0_i32 = arith.constant 0 : i32
    %c0_i32_0 = arith.constant 0 : i32
    %c0_i32_1 = arith.constant 0 : i32
    return %c0_i32, %c0_i32_0 : i32, i32
  }
  func.func @transform_4(%arg0: i32) -> i32 {
    %c0_i32 = arith.constant 0 : i32
    %c0_i32_0 = arith.constant 0 : i32
    return %c0_i32 : i32
  }
  func.func @transform_5(%arg0: i32) -> (i32, i32, i32) {
    %c0_i32 = arith.constant 0 : i32
    %c0_i32_0 = arith.constant 0 : i32
    %c0_i32_1 = arith.constant 0 : i32
    return %c0_i32, %arg0, %c0_i32_0 : i32, i32, i32
  }
}

</mosaic_0001>

<bundles_post_ra>
// kernel: tpu_custom_call.1
= control target key start
LH: loop header
LB: loop body
LE: loop exit
PB: predicated region body
PF: predicated region fallthrough
CT: control target
= control target key end

     0   :  { %10 = vsyncpa [#allocation4], 0  ;;  %s996_s0 = inlined_call_operand.vmem [shape: f32[4,1,128], index: 0, kind: input, shape index: {}]   ;;  %s997_s1 = inlined_call_operand.vmem [shape: f32[10,4], index: 1, kind: input, shape index: {}]   ;;  %s998_s2 = inlined_call_operand.vmem [shape: f32[10], index: 2, kind: input, shape index: {}]   ;;  %s999_s3 = inlined_call_operand.vmem [shape: f32[3,10], index: 3, kind: input, shape index: {}]   ;;  %s1000_s4 = inlined_call_operand.vmem [shape: f32[3], index: 4, kind: input, shape index: {}]   ;;  %s1001_s5 = inlined_call_operand.hbm [shape: f32[3,1,128], index: 5, kind: output, shape index: {}]  }
   0x1   :  { %11 = vsyncpa [#allocation6], 0 }
   0x2   :  { %12 = vsyncpa [#allocation9], 0  ;;  %s34_s20 = sshll.u32 %s998_s2, 4  ;;  %s35_s20 = int_to_ptr.vmem [resolvable:$true] %s34_s20 }
   0x3   :  { %13 = vsyncpa [#allocation3], 0  ;;  %s21_s23 = sshll.u32 %s997_s1, 4  ;;  %s517_s24 = scalar_lea.vmem %s35_s20, 16  ;;  %s22_s23 = int_to_ptr.vmem [resolvable:$true] %s21_s23 }
   0x4   :  { %p518_p0 = scmp.ne.s32.totalorder %s35_s20, %s517_s24  ;;  %p522_p1 = scmp.lt.s32.totalorder %s35_s20, %s35_s20 }
   0x5   :  { %p523_p2 = scmp.lt.s32.totalorder %s517_s24, %s517_s24 }
   0x7   :  { %p524_p3 = por %p523_p2, %p522_p1 }
   0x9   :  { %p525_p4 = pnand %p524_p3, %p518_p0 }
   0xb   :  { %528 = shalt.err (!%p525_p4)
}
   0xc   :  { %s595_s25 = smov [#allocation5]   ;;  %s529_s26 = scalar_lea.vmem %s22_s23, 256 }
   0xd   :  { %37 = dma.vmem_to_smem %s35_s20, 16, %s595_s25, [#allocation6]  }
   0xe   :  { %p530_p5 = scmp.ne.s32.totalorder %s22_s23, %s529_s26  ;;  %p534_p6 = scmp.lt.s32.totalorder %s22_s23, %s22_s23 }
   0xf   :  { %p535_p7 = scmp.lt.s32.totalorder %s529_s26, %s529_s26 }
  0x11   :  { %p536_p8 = por %p535_p7, %p534_p6 }
  0x13   :  { %p537_p9 = pnand %p536_p8, %p530_p5 }
  0x15   :  { %540 = shalt.err (!%p537_p9)
}
  0x16   :  { %s596_s2 = smov [#allocation2]   ;;  %s597_s27 = smov 128  }
  0x17   :  { %s598_s1 = smov 8   ;;  %s44_s30 = sshll.u32 %s999_s3, 4  ;;  %s45_s30 = int_to_ptr.vmem [resolvable:$true] %s44_s30 }
  0x18   :  { %27 = dma.vmem_to_smem %s22_s23, 256, %s596_s2, [#allocation4], %s597_s27, %s597_s27, %s598_s1  }
  0x19   :  { %s54_s8 = sshll.u32 %s1000_s4, 4  ;;  %s541_s9 = scalar_lea.vmem %s45_s30, 64  ;;  %s55_s8 = int_to_ptr.vmem [resolvable:$true] %s54_s8 }
  0x1a   :  { %p542_p10 = scmp.ne.s32.totalorder %s45_s30, %s541_s9  ;;  %p546_p11 = scmp.lt.s32.totalorder %s45_s30, %s45_s30 }
  0x1b   :  { %p547_p12 = scmp.lt.s32.totalorder %s541_s9, %s541_s9 }
  0x1d   :  { %p548_p13 = por %p547_p12, %p546_p11 }
  0x1f   :  { %p549_p0 = pnand %p548_p13, %p542_p10 }
  0x21   :  { %552 = shalt.err (!%p549_p0)
}
  0x22   :  { %s599_s10 = smov [#allocation7]   ;;  %s553_s11 = scalar_lea.vmem %s55_s8, 16 }
  0x23   :  { %47 = dma.vmem_to_smem %s45_s30, 64, %s599_s10, [#allocation6]  }
  0x24   :  { %p554_p1 = scmp.ne.s32.totalorder %s55_s8, %s553_s11  ;;  %p558_p2 = scmp.lt.s32.totalorder %s55_s8, %s55_s8 }
  0x25   :  { %p559_p3 = scmp.lt.s32.totalorder %s553_s11, %s553_s11 }
  0x27   :  { %p560_p4 = por %p559_p3, %p558_p2 }
  0x29   :  { %p561_p5 = pnand %p560_p4, %p554_p1 }
  0x2b   :  { %564 = shalt.err (!%p561_p5)
}
  0x2c   :  { %s600_s3 = smov [#allocation8]  }
  0x2d   :  { %57 = dma.vmem_to_smem %s55_s8, 16, %s600_s3, [#allocation9]  }
  0x2e   :  { %587 = dma.done.wait [#allocation4], 256  }
  0x2f   :  { %588 = vsyncadd [#allocation4], 4294967040 }
  0x30   :  { %589 = dma.done.wait [#allocation6], 80  }
  0x31   :  { %590 = vsyncadd [#allocation6], 4294967216 }
  0x32   :  { %591 = dma.done.wait [#allocation9], 16  }
  0x33   :  { %592 = vsyncadd [#allocation9], 4294967280 }
  0x34   :  { %70 = sfence }
  0x35   :  { %s71_s4 = sld [smem:[#allocation2]]  ;;  %s426_s12 = sld [smem:[#allocation2 + $0x1]]  ;;  %v649_v0 = vld [vmem:[%s996_s0] sm:$0x1]  ;;  %v658_v1 = vld [vmem:[%s996_s0 + $0x1] sm:$0x1] }
  0x36   :  { %s427_s13 = sld [smem:[#allocation2 + $0x2]]  ;;  %s428_s14 = sld [smem:[#allocation2 + $0x3]]  ;;  %v667_v2 = vld [vmem:[%s996_s0 + $0x2] sm:$0x1]  ;;  %v676_v3 = vld [vmem:[%s996_s0 + $0x3] sm:$0x1] }
  0x37   :  { %s429_s15 = sld [smem:[#allocation2 + $0x80]]  ;;  %s430_s16 = sld [smem:[#allocation2 + $0x81]] }
  0x38   :  { %s651_s19 = sld [smem:[#allocation2 + $0x82]]  ;;  %s653_s20 = sld [smem:[#allocation2 + $0x83]] }
  0x39   :  { %s660_s23 = sld [smem:[#allocation2 + $0x100]]  ;;  %s662_s24 = sld [smem:[#allocation2 + $0x101]] }
  0x3a   :  { %s669_s2 = sld [smem:[#allocation2 + $0x102]]  ;;  %s671_s27 = sld [smem:[#allocation2 + $0x103]] }
  0x3b   :  { %s678_s29 = sld [smem:[#allocation2 + $0x180]]  ;;  %s680_s30 = sld [smem:[#allocation2 + $0x181]]  ;;  %v164_v4 = vstv %s71_s4  ;;  %v166_v5 = vstv %s426_s12 }
  0x3c   :  { %s682_s6 = sld [smem:[#allocation2 + $0x182]]  ;;  %s684_s7 = sld [smem:[#allocation2 + $0x183]]  ;;  %v165_v6 = vmul.f32 %v164_v4, %v649_v0  ;;  %v167_v7 = vmul.f32 %v658_v1, %v166_v5  ;;  %v169_v8 = vstv %s427_s13  ;;  %v172_v9 = vstv %s428_s14 }
  0x3d   :  { %s688_s0 = sld [smem:[#allocation2 + $0x200]]  ;;  %s690_s8 = sld [smem:[#allocation2 + $0x201]]  ;;  %v170_v10 = vmul.f32 %v667_v2, %v169_v8  ;;  %v173_v11 = vmul.f32 %v676_v3, %v172_v9  ;;  %v178_v12 = vstv %s429_s15  ;;  %v180_v13 = vstv %s430_s16 }
  0x3e   :  { %s694_s9 = sld [smem:[#allocation2 + $0x202]]  ;;  %v168_v14 = vadd.f32 %v167_v7, %v165_v6  ;;  %v179_v15 = vmul.f32 %v178_v12, %v649_v0  ;;  %v181_v16 = vmul.f32 %v658_v1, %v180_v13  ;;  %v183_v17 = vstv %s651_s19  ;;  %s699_s10 = sld [smem:[#allocation2 + $0x203]] }
  0x3f   :  { %s701_s11 = sld [smem:[#allocation2 + $0x280]]  ;;  %v184_v18 = vmul.f32 %v667_v2, %v183_v17  ;;  %v186_v19 = vstv %s653_s20  ;;  %v192_v20 = vstv %s660_s23  ;;  %v194_v21 = vstv %s662_s24  ;;  %s707_s3 = sld [smem:[#allocation2 + $0x281]] }
  0x40   :  { %s709_s4 = sld [smem:[#allocation2 + $0x282]]  ;;  %v171_v22 = vadd.f32 %v170_v10, %v168_v14  ;;  %v182_v23 = vadd.f32 %v181_v16, %v179_v15  ;;  %v187_v24 = vmul.f32 %v676_v3, %v186_v19  ;;  %v193_v25 = vmul.f32 %v192_v20, %v649_v0  ;;  %s713_s12 = sld [smem:[#allocation2 + $0x283]] }
  0x41   :  { %s715_s13 = sld [smem:[#allocation2 + $0x300]]  ;;  %v195_v26 = vmul.f32 %v658_v1, %v194_v21  ;;  %v197_v27 = vstv %s669_s2  ;;  %v200_v28 = vstv %s671_s27  ;;  %v206_v29 = vstv %s678_s29  ;;  %s724_s14 = sld [smem:[#allocation2 + $0x301]] }
  0x42   :  { %v721_v30 = vadd.f32 %v173_v11, %v171_v22  ;;  %v185_v31 = vadd.f32 %v184_v18, %v182_v23  ;;  %v198_v32 = vmul.f32 %v667_v2, %v197_v27  ;;  %s726_s15 = sld [smem:[#allocation2 + $0x302]]  ;;  %v207_v34 = vmul.f32 %v206_v29, %v649_v0  ;;  %s731_s16 = sld [smem:[#allocation2 + $0x303]] }
  0x43   :  { %v196_v33 = vadd.f32 %v195_v26, %v193_v25  ;;  %v208_v35 = vstv %s680_s30  ;;  %v211_v36 = vstv %s682_s6  ;;  %v201_v37 = vmul.f32 %v676_v3, %v200_v28  ;;  %s737_s17 = sld [smem:[#allocation2 + $0x380]]  ;;  %s739_s18 = sld [smem:[#allocation2 + $0x381]] }
  0x44   :  { %v209_v38 = vmul.f32 %v658_v1, %v208_v35  ;;  %v212_v39 = vmul.f32 %v667_v2, %v211_v36  ;;  %v214_v40 = vstv %s684_s7  ;;  %v188_v41 = vadd.f32 %v187_v24, %v185_v31  ;;  %s743_s19 = sld [smem:[#allocation2 + $0x382]]  ;;  %s754_s20 = sld [smem:[#allocation5]] }
  0x45   :  { %v199_v42 = vadd.f32 %v198_v32, %v196_v33  ;;  %v220_v43 = vstv %s688_s0  ;;  %v222_v44 = vstv %s690_s8  ;;  %v225_v48 = vstv %s694_s9  ;;  %s756_s21 = sld [smem:[#allocation5 + $0x1]]  ;;  %s762_s22 = sld [smem:[#allocation5 + $0x2]] }
  0x46   :  { %v210_v45 = vadd.f32 %v209_v38, %v207_v34  ;;  %v221_v46 = vmul.f32 %v220_v43, %v649_v0  ;;  %v223_v47 = vmul.f32 %v658_v1, %v222_v44  ;;  %v215_v49 = vmul.f32 %v676_v3, %v214_v40  ;;  %s764_s23 = sld [smem:[#allocation5 + $0x3]]  ;;  %s768_s24 = sld [smem:[#allocation5 + $0x4]] }
  0x47   :  { %v226_v50 = vmul.f32 %v667_v2, %v225_v48  ;;  %v228_v51 = vstv %s699_s10  ;;  %v234_v52 = vstv %s701_s11  ;;  %v236_v57 = vstv %s707_s3  ;;  %s770_s25 = sld [smem:[#allocation5 + $0x5]]  ;;  %s775_s26 = sld [smem:[#allocation2 + $0x383]] }
  0x48   :  { %v213_v53 = vadd.f32 %v212_v39, %v210_v45  ;;  %v224_v54 = vadd.f32 %v223_v47, %v221_v46  ;;  %v229_v55 = vmul.f32 %v676_v3, %v228_v51  ;;  %v235_v56 = vmul.f32 %v234_v52, %v649_v0  ;;  %s777_s2 = sld [smem:[#allocation5 + $0x6]]  ;;  %s781_s27 = sld [smem:[#allocation2 + $0x400]] }
  0x49   :  { %v239_v58 = vstv %s709_s4  ;;  %v242_v59 = vstv %s713_s12  ;;  %v248_v60 = vstv %s715_s13  ;;  %v202_v61 = vadd.f32 %v201_v37, %v199_v42  ;;  %s787_s1 = sld [smem:[#allocation2 + $0x401]]  ;;  %s789_s28 = sld [smem:[#allocation2 + $0x402]] }
  0x4a   :  { %v227_v62 = vadd.f32 %v226_v50, %v224_v54  ;;  %v237_v63 = vmul.f32 %v658_v1, %v236_v57  ;;  %v240_v4 = vmul.f32 %v667_v2, %v239_v58  ;;  %v216_v5 = vadd.f32 %v215_v49, %v213_v53  ;;  %s793_s29 = sld [smem:[#allocation2 + $0x403]]  ;;  %s799_s30 = sld [smem:[#allocation2 + $0x480]] }
  0x4b   :  { %v249_v6 = vmul.f32 %v248_v60, %v649_v0  ;;  %v250_v7 = vstv %s724_s14  ;;  %v253_v8 = vstv %s726_s15  ;;  %v243_v11 = vmul.f32 %v676_v3, %v242_v59  ;;  %s801_s6 = sld [smem:[#allocation2 + $0x481]]  ;;  %s806_s7 = sld [smem:[#allocation2 + $0x482]] }
  0x4c   :  { %v230_v9 = vadd.f32 %v229_v55, %v227_v62  ;;  %v238_v10 = vadd.f32 %v237_v63, %v235_v56  ;;  %v251_v12 = vmul.f32 %v658_v1, %v250_v7  ;;  %v254_v13 = vmul.f32 %v667_v2, %v253_v8  ;;  %s808_s0 = sld [smem:[#allocation5 + $0x7]]  ;;  %s811_s8 = sld [smem:[#allocation2 + $0x483]] }
  0x4d   :  { %v256_v14 = vstv %s731_s16  ;;  %v262_v15 = vstv %s737_s17  ;;  %v264_v16 = vstv %s739_s18  ;;  %v267_v20 = vstv %s743_s19  ;;  %s813_s9 = sld [smem:[#allocation5 + $0x8]]  ;;  %s825_s11 = sld [smem:[#allocation7 + $0x1]] }
  0x4e   :  { %v241_v17 = vadd.f32 %v240_v4, %v238_v10  ;;  %v252_v18 = vadd.f32 %v251_v12, %v249_v6  ;;  %v257_v19 = vmul.f32 %v676_v3, %v256_v14  ;;  %v175_v21 = vstv %s754_s20  ;;  %s823_s10 = sld [smem:[#allocation7]]  ;;  %s829_s3 = sld [smem:[#allocation7 + $0x2]] }
  0x4f   :  { %v189_v22 = vstv %s756_s21  ;;  %v263_v23 = vmul.f32 %v262_v15, %v649_v0  ;;  %v265_v24 = vmul.f32 %v658_v1, %v264_v16  ;;  %v176_v25 = vadd.f32 %v175_v21, %v721_v30  ;;  %s831_s4 = sld [smem:[#allocation7 + $0x3]]  ;;  %s838_s12 = sld [smem:[#allocation7 + $0x4]] }
  0x50   :  { %v190_v26 = vadd.f32 %v189_v22, %v188_v41  ;;  %v203_v27 = vstv %s762_s22  ;;  %v217_v28 = vstv %s764_s23  ;;  %v231_v32 = vstv %s768_s24  ;;  %s840_s13 = sld [smem:[#allocation7 + $0x5]]  ;;  %s848_s14 = sld [smem:[#allocation5 + $0x9]] }
  0x51   :  { %v204_v29 = vadd.f32 %v203_v27, %v202_v61  ;;  %v218_v31 = vadd.f32 %v217_v28, %v216_v5  ;;  %v244_v33 = vadd.f32 %v243_v11, %v241_v17  ;;  %v232_v34 = vadd.f32 %v231_v32, %v230_v9  ;;  %s850_s15 = sld [smem:[#allocation7 + $0x6]]  ;;  %s859_s16 = sld [smem:[#allocation7 + $0x7]] }
  0x52   :  { %v245_v35 = vstv %s770_s25  ;;  %v268_v30 = vmul.f32 %v667_v2, %v267_v20  ;;  %v817_v36 = vmax.f32 %v176_v25, 0.0  ;;  %v819_v37 = vmax.f32 %v190_v26, 0.0  ;;  %s861_s17 = sld [smem:[#allocation7 + $0x80]]  ;;  %s869_s19 = sld [smem:[#allocation7 + $0x9]] }
  0x53   :  { %v821_v38 = vmax.f32 %v204_v29, 0.0  ;;  %v255_v39 = vadd.f32 %v254_v13, %v252_v18  ;;  %v246_v40 = vadd.f32 %v245_v35, %v244_v33  ;;  %v259_v41 = vstv %s777_s2  ;;  %s867_s18 = sld [smem:[#allocation7 + $0x8]]  ;;  %s875_s20 = sld [smem:[#allocation7 + $0x81]] }
  0x54   :  { %v266_v42 = vadd.f32 %v265_v24, %v263_v23  ;;  %v270_v43 = vstv %s775_s26  ;;  %v833_v44 = vmax.f32 %v218_v31, 0.0  ;;  %v835_v45 = vmax.f32 %v232_v34, 0.0  ;;  %s877_s21 = sld [smem:[#allocation7 + $0x82]]  ;;  %s882_s22 = sld [smem:[#allocation7 + $0x83]] }
  0x55   :  { %v258_v46 = vadd.f32 %v257_v19, %v255_v39  ;;  %v271_v47 = vmul.f32 %v676_v3, %v270_v43  ;;  %v276_v49 = vstv %s781_s27  ;;  %v278_v50 = vstv %s787_s1  ;;  %s886_s23 = sld [smem:[#allocation7 + $0x84]]  ;;  %s888_s24 = sld [smem:[#allocation7 + $0x85]] }
  0x56   :  { %v269_v48 = vadd.f32 %v268_v30, %v266_v42  ;;  %v281_v51 = vstv %s789_s28  ;;  %v277_v53 = vmul.f32 %v276_v49, %v649_v0  ;;  %v279_v54 = vmul.f32 %v658_v1, %v278_v50  ;;  %s894_s25 = sld [smem:[#allocation7 + $0x86]]  ;;  %s903_s26 = sld [smem:[#allocation7 + $0x87]] }
  0x57   :  { %v260_v52 = vadd.f32 %v259_v41, %v258_v46  ;;  %v282_v55 = vmul.f32 %v667_v2, %v281_v51  ;;  %v852_v56 = vmax.f32 %v246_v40, 0.0  ;;  %v284_v58 = vstv %s793_s29  ;;  %s905_s2 = sld [smem:[#allocation7 + $0x100]]  ;;  %s914_s1 = sld [smem:[#allocation7 + $0x101]] }
  0x58   :  { %v272_v57 = vadd.f32 %v271_v47, %v269_v48  ;;  %v290_v59 = vstv %s799_s30  ;;  %v273_v60 = vstv %s808_s0  ;;  %v280_v61 = vadd.f32 %v279_v54, %v277_v53  ;;  %s912_s27 = sld [smem:[#allocation7 + $0x88]]  ;;  %s918_s28 = sld [smem:[#allocation7 + $0x102]] }
  0x59   :  { %v285_v62 = vmul.f32 %v676_v3, %v284_v58  ;;  %v291_v63 = vmul.f32 %v290_v59, %v649_v0  ;;  %v287_v4 = vstv %s813_s9  ;;  %v292_v5 = vstv %s801_s6  ;;  %s920_s29 = sld [smem:[#allocation7 + $0x103]]  ;;  %s929_s30 = sld [smem:[#allocation7 + $0x104]] }
  0x5a   :  { %v295_v6 = vstv %s806_s7  ;;  %v298_v7 = vstv %s811_s8  ;;  %v871_v8 = vmax.f32 %v260_v52, 0.0  ;;  %v283_v9 = vadd.f32 %v282_v55, %v280_v61  ;;  %s931_s6 = sld [smem:[#allocation8]]  ;;  %s940_s7 = sld [smem:[#allocation7 + $0x89]] }
  0x5b   :  { %v293_v0 = vmul.f32 %v658_v1, %v292_v5  ;;  %v296_v10 = vmul.f32 %v667_v2, %v295_v6  ;;  %v274_v11 = vadd.f32 %v273_v60, %v272_v57  ;;  %v299_v12 = vmul.f32 %v676_v3, %v298_v7  ;;  %s942_s0 = sld [smem:[#allocation7 + $0x105]]  ;;  %s946_s8 = sld [smem:[#allocation7 + $0x106]] }
  0x5c   :  { %v304_v13 = vstv %s823_s10  ;;  %v306_v14 = vstv %s825_s11  ;;  %v286_v15 = vadd.f32 %v285_v62, %v283_v9  ;;  %v309_v17 = vstv %s829_s3  ;;  %s954_s9 = sld [smem:[#allocation7 + $0x107]]  ;;  %s962_s10 = sld [smem:[#allocation7 + $0x108]] }
  0x5d   :  { %v294_v16 = vadd.f32 %v293_v0, %v291_v63  ;;  %v305_v1 = vmul.f32 %v304_v13, %v817_v36  ;;  %v307_v2 = vmul.f32 %v306_v14, %v819_v37  ;;  %v312_v18 = vstv %s831_s4  ;;  %s964_s11 = sld [smem:[#allocation8 + $0x1]]  ;;  %s504_s4 = sld [smem:[#allocation8 + $0x2]] }
  0x5e   :  { %v315_v19 = vstv %s838_s12  ;;  %v318_v3 = vstv %s840_s13  ;;  %v288_v20 = vadd.f32 %v287_v4, %v286_v15  ;;  %v310_v23 = vmul.f32 %v309_v17, %v821_v38  ;;  %s502_s3 = sld [smem:[#allocation7 + $0x109]]  ;;  %s601_s12 = smov [#allocation10]  }
  0x5f   :  { %v297_v21 = vadd.f32 %v296_v10, %v294_v16  ;;  %v308_v22 = vadd.f32 %v307_v2, %v305_v1  ;;  %v301_v24 = vstv %s848_s14  ;;  %v313_v25 = vmul.f32 %v312_v18, %v833_v44  ;;  %s407_s13 = sshll.u32 %s601_s12, 4  ;;  %s408_s13 = int_to_ptr.vmem [resolvable:$true] %s407_s13 }
  0x60   :  { %v321_v26 = vstv %s850_s15  ;;  %v900_v27 = vmax.f32 %v274_v11, 0.0  ;;  %v316_v31 = vmul.f32 %v315_v19, %v835_v45  ;;  %v907_v32 = vmax.f32 %v288_v20, 0.0  ;;  %s565_s14 = scalar_lea.vmem %s408_s13, 48  ;;  %s569_s15 = scalar_lea.vmem %s408_s13, 64 }
  0x61   :  { %v300_v28 = vadd.f32 %v299_v12, %v297_v21  ;;  %v311_v29 = vadd.f32 %v310_v23, %v308_v22  ;;  %v319_v33 = vmul.f32 %v318_v3, %v852_v56  ;;  %v324_v34 = vstv %s859_s16  ;;  %p566_p6 = scmp.ne.s32.totalorder %s408_s13, %s565_s14  ;;  %p570_p7 = scmp.lt.s32.totalorder %s408_s13, %s408_s13 }
  0x62   :  { %v336_v35 = vstv %s861_s17  ;;  %v322_v40 = vmul.f32 %v321_v26, %v871_v8  ;;  %v327_v41 = vstv %s867_s18  ;;  %v330_v42 = vstv %s869_s19  ;;  %p571_p8 = scmp.lt.s32.totalorder %s569_s15, %s565_s14 }
  0x63   :  { %v302_v30 = vadd.f32 %v301_v24, %v300_v28  ;;  %v314_v39 = vadd.f32 %v313_v25, %v311_v29  ;;  %v337_v43 = vmul.f32 %v336_v35, %v817_v36  ;;  %v338_v46 = vstv %s875_s20 }
  0x64   :  { %v341_v47 = vstv %s877_s21  ;;  %v325_v49 = vmul.f32 %v324_v34, %v900_v27  ;;  %v339_v50 = vmul.f32 %v338_v46, %v819_v37  ;;  %v344_v53 = vstv %s882_s22  ;;  %p572_p9 = por %p571_p8, %p570_p7 }
  0x65   :  { %v317_v48 = vadd.f32 %v316_v31, %v314_v39  ;;  %v342_v51 = vmul.f32 %v341_v47, %v821_v38  ;;  %v933_v52 = vmax.f32 %v302_v30, 0.0  ;;  %v347_v54 = vstv %s886_s23 }
  0x66   :  { %v350_v55 = vstv %s888_s24  ;;  %v340_v58 = vadd.f32 %v339_v50, %v337_v43  ;;  %v345_v59 = vmul.f32 %v344_v53, %v833_v44  ;;  %v353_v60 = vstv %s894_s25  ;;  %p573_p10 = pnand %p572_p9, %p566_p6 }
  0x67   :  { %v320_v57 = vadd.f32 %v319_v33, %v317_v48  ;;  %v328_v62 = vmul.f32 %v327_v41, %v907_v32  ;;  %v348_v4 = vmul.f32 %v347_v54, %v835_v45  ;;  %v331_v5 = vmul.f32 %v330_v42, %v933_v52 }
  0x68   :  { %v343_v63 = vadd.f32 %v342_v51, %v340_v58  ;;  %v351_v6 = vmul.f32 %v350_v55, %v852_v56  ;;  %v354_v7 = vmul.f32 %v353_v60, %v871_v8  ;;  %v369_v9 = vstv %s905_s2 }
  0x69   :  { %v323_v61 = vadd.f32 %v322_v40, %v320_v57  ;;  %v356_v11 = vstv %s903_s26  ;;  %v370_v12 = vmul.f32 %v369_v9, %v817_v36  ;;  %v359_v13 = vstv %s912_s27 }
  0x6a   :  { %v346_v10 = vadd.f32 %v345_v59, %v343_v63  ;;  %v371_v14 = vstv %s914_s1  ;;  %v374_v15 = vstv %s918_s28  ;;  %v377_v16 = vstv %s920_s29 }
  0x6b   :  { %v326_v0 = vadd.f32 %v325_v49, %v323_v61  ;;  %v372_v17 = vmul.f32 %v371_v14, %v819_v37  ;;  %v375_v18 = vmul.f32 %v374_v15, %v821_v38  ;;  %v333_v36 = vstv %s931_s6 }
  0x6c   :  { %v349_v2 = vadd.f32 %v348_v4, %v346_v10  ;;  %v357_v19 = vmul.f32 %v356_v11, %v900_v27  ;;  %v380_v3 = vstv %s929_s30  ;;  %v378_v23 = vmul.f32 %v377_v16, %v833_v44 }
  0x6d   :  { %v329_v1 = vadd.f32 %v328_v62, %v326_v0  ;;  %v373_v22 = vadd.f32 %v372_v17, %v370_v12  ;;  %v360_v37 = vmul.f32 %v359_v13, %v907_v32  ;;  %v362_v24 = vstv %s940_s7 }
  0x6e   :  { %v352_v21 = vadd.f32 %v351_v6, %v349_v2  ;;  %v383_v38 = vstv %s942_s0  ;;  %v381_v29 = vmul.f32 %v380_v3, %v835_v45  ;;  %v386_v31 = vstv %s946_s8 }
  0x6f   :  { %v332_v20 = vadd.f32 %v331_v5, %v329_v1  ;;  %v376_v28 = vadd.f32 %v375_v18, %v373_v22  ;;  %v363_v34 = vmul.f32 %v362_v24, %v933_v52  ;;  %v384_v44 = vmul.f32 %v383_v38, %v852_v56 }
  0x70   :  { %v355_v26 = vadd.f32 %v354_v7, %v352_v21  ;;  %v389_v30 = vstv %s954_s9  ;;  %v387_v41 = vmul.f32 %v386_v31, %v871_v8  ;;  %v365_v42 = vstv %s964_s11 }
  0x71   :  { %v334_v25 = vadd.f32 %v333_v36, %v332_v20  ;;  %v379_v35 = vadd.f32 %v378_v23, %v376_v28  ;;  %v392_v43 = vstv %s962_s10  ;;  %v390_v45 = vmul.f32 %v389_v30, %v900_v27 }
  0x72   :  { %v358_v33 = vadd.f32 %v357_v19, %v355_v26  ;;  %v395_v48 = vstv %s502_s3  ;;  %v393_v51 = vmul.f32 %v392_v43, %v907_v32  ;;  %v398_v55 = vstv %s504_s4 }
  0x73   :  { %335 = vst [vmem:[#allocation10] sm:$0x1] %v334_v25  ;;  %v382_v40 = vadd.f32 %v381_v29, %v379_v35  ;;  %v396_v56 = vmul.f32 %v395_v48, %v933_v52 }
  0x74   :  { %v361_v39 = vadd.f32 %v360_v37, %v358_v33 }
  0x75   :  { %v385_v47 = vadd.f32 %v384_v44, %v382_v40 }
  0x76   :  { %v364_v46 = vadd.f32 %v363_v34, %v361_v39 }
  0x77   :  { %v388_v50 = vadd.f32 %v387_v41, %v385_v47 }
  0x78   :  { %v366_v49 = vadd.f32 %v365_v42, %v364_v46 }
  0x79   :  { %v391_v53 = vadd.f32 %v390_v45, %v388_v50 }
  0x7a   :  { %368 = vst [vmem:[#allocation10 + $0x1] sm:$0x1] %v366_v49 }
  0x7b   :  { %v394_v54 = vadd.f32 %v393_v51, %v391_v53 }
  0x7d   :  { %v397_v8 = vadd.f32 %v396_v56, %v394_v54 }
  0x7f   :  { %v399_v57 = vadd.f32 %v398_v55, %v397_v8 }
  0x81   :  { %401 = vst [vmem:[#allocation10 + $0x2] sm:$0x1] %v399_v57 }
  0x82   :  { %576 = shalt.err (!%p573_p10)
}
  0x83   :  { %s577_s18 = scalar_lea.hbm %s1001_s5, 48 }
  0x84   :  { %p578_p11 = scmp.ne.s32.totalorder %s1001_s5, %s577_s18  ;;  %p581_p12 = scmp.lt.u32.totalorder %s577_s18, %s1001_s5 }
  0x86   :  { %p583_p13 = pnand %p581_p12, %p578_p11 }
  0x88   :  { %586 = shalt.err (!%p583_p13)
}
  0x89   :  { %s602_s23 = smov 16   ;;  %s603_s24 = smov 1  }
  0x8a   :  { %413 = dma.vmem_to_hbm [thread:$0]  %s408_s13, 48, %s1001_s5, [#allocation3], %s602_s23, %s602_s23, %s603_s24  }
  0x8b   :  { %593 = dma.done.wait [#allocation3], 48  }
  0x8c   :  { %594 = vsyncadd [#allocation3], 4294967248 }
  0x8d   :  { %417 = vsyncpa [#allocation3], 1 }
  0x8e   :  { %418 = vsyncpa [#allocation4], 1 }
  0x8f   :  { %419 = vsyncpa [#allocation6], 1 }
  0x90   :  { %420 = vsyncpa [#allocation9], 1 }

</bundles_post_ra>
